<compile_context>
chip_gen: v5e
topology: v5e:2x2
jax: 0.10.0
libtpu: 0.0.40
codegen_flags: <defaults>
</compile_context>

<pallas_src>
from functools import partial

import numpy as np
import jax
import jax.numpy as jnp
from jax import lax
from jax.experimental import pallas as pl
from jax.experimental.pallas import tpu as pltpu


# --------------------------------------------------------------------------- #
# Kernels
# --------------------------------------------------------------------------- #
def _psi_accum_kernel(vt_ref, w1_ref, b1_ref, w2_ref, b2_ref, e_ref, a_ref,
                      *, bt, cdt):
    """Pass A: a[b, c] += sum_n psi(v)[b, n, c] * v[b, n, i(c)] over this N-chunk.

    vt_ref : (bt, Cin, nc)  transposed input chunk (N on lanes), compute dtype
    a_ref  : (1, bt, OIR)   f32 accumulator, resident across the N-chunk axis
    """
    @pl.when(pl.program_id(1) == 0)
    def _init():
        a_ref[...] = jnp.zeros_like(a_ref)

    w1 = w1_ref[...]                       # (KW, Cin)   compute dtype
    b1 = b1_ref[...]                       # (KW, 1)     f32
    w2 = w2_ref[...]                       # (OIR, KW)   compute dtype
    b2 = b2_ref[...]                       # (OIR, 1)    f32
    e = e_ref[...]                         # (Cin, OIR)  f32 0/1 selector

    def body(b, carry):
        vtb = vt_ref[b]                                                   # (Cin, nc)
        h = jnp.maximum(
            jnp.dot(w1, vtb, preferred_element_type=jnp.float32) + b1, 0.0)   # (KW, nc) f32
        # TODO(synk): keep psi_t (and vtb) in f32 on accuracy-sensitive runs;
        # the bf16 K=nc contraction below was only validated at small N.
        psi_t = (jnp.dot(w2, h.astype(cdt), preferred_element_type=jnp.float32)
                 + b2)                                                    # (OIR, nc) f32
        # P[i, c] = sum_n v[n, i] * psi[n, c]  (contraction over the lane/N axis)
        p = lax.dot_general(vtb, psi_t.astype(cdt), (((1,), (1,)), ((), ())),
                            preferred_element_type=jnp.float32)           # (Cin, OIR)
        part = jnp.sum(p * e, axis=0, keepdims=True)                      # (1, OIR)
        row = pl.ds(b, 1)
        a_ref[0, row, :] = a_ref[0, row, :] + part
        return carry

    lax.fori_loop(0, bt, body, 0, unroll=bt <= 4)


def _phi_out_kernel(vt_ref, a_ref, w1_ref, b1_ref, w2_ref, b2_ref, gt_ref, o_ref,
                    *, bt, cout, cdt):
    """Pass B: out[b, o, m] = sum_c G^T[o, c] * a[b, c] * phi(v)[b, m, c] per chunk.

    vt_ref : (bt, Cin, nc)     a_ref : (1, bt, OIR) f32
    o_ref  : (1, bt*Cout, nc)  lane-dense output slab (N on lanes)
    """
    w1 = w1_ref[...]
    b1 = b1_ref[...]
    w2 = w2_ref[...]
    b2 = b2_ref[...]
    gt = gt_ref[...]                       # (Cout, OIR) f32 0/1 selector

    def body(b, carry):
        vtb = vt_ref[b]                                                   # (Cin, nc)
        h = jnp.maximum(
            jnp.dot(w1, vtb, preferred_element_type=jnp.float32) + b1, 0.0)   # (KW, nc)
        phi_t = (jnp.dot(w2, h.astype(cdt), preferred_element_type=jnp.float32)
                 + b2)                                                    # (OIR, nc) f32
        a_b = a_ref[0, pl.ds(b, 1), :]                                    # (1, OIR)  f32
        ga = (gt * a_b).astype(cdt)                                       # (Cout, OIR)
        out_c = jnp.dot(ga, phi_t.astype(cdt),
                        preferred_element_type=jnp.float32)               # (Cout, nc)
        rows = pl.ds(pl.multiple_of(b * cout, cout), cout)
        o_ref[0, rows, :] = out_c
        return carry

    lax.fori_loop(0, bt, body, 0, unroll=bt <= 4)


# --------------------------------------------------------------------------- #
# Wrapper
# --------------------------------------------------------------------------- #
def make_params(key, in_channels, out_channels, ker_width, rank):
    """Deterministic synthetic params matching torch.nn.Linear shapes."""
    oir = in_channels * out_channels * rank
    ks = jax.random.split(key, 8)

    def linear(kw, kb, fan_in, fan_out):
        bound = 1.0 / np.sqrt(fan_in)
        W = jax.random.uniform(kw, (fan_out, fan_in), jnp.float32, -bound, bound)
        b = jax.random.uniform(kb, (fan_out,), jnp.float32, -bound, bound)
        return W, b

    W1p, b1p = linear(ks[0], ks[1], in_channels, ker_width)
    W2p, b2p = linear(ks[2], ks[3], ker_width, oir)
    W1s, b1s = linear(ks[4], ks[5], in_channels, ker_width)
    W2s, b2s = linear(ks[6], ks[7], ker_width, oir)
    return dict(W1_phi=W1p, b1_phi=b1p, W2_phi=W2p, b2_phi=b2p,
                W1_psi=W1s, b1_psi=b1s, W2_psi=W2s, b2_psi=b2s)


def _pick_tiles(B, N, Cin, KW, OIR, Cout, op_itemsize, budget_bytes):
    """Size the batch fold (bt) and the N lane-chunk (nc) from a VMEM budget."""
    per_col = 4 * (KW + OIR + Cout) + op_itemsize * Cin   # bytes per lane column per batch
    if N > 128 and N % 128 == 0:
        nc = (budget_bytes // (4 * max(per_col, 1))) // 128 * 128
        nc = int(max(128, min(N, nc)))
        while N % nc:
            nc -= 128
    else:
        nc = N                      # small / odd N: single chunk (block == full dim)
    per_batch = per_col * nc + 4 * Cin * OIR
    cap = max(1, int(budget_bytes // max(per_batch, 1)))
    bt = 1
    for d in range(min(B, cap), 0, -1):
        if B % d == 0:
            bt = d
            break
    # NOTE: a >=2-step batch grid only matters for megacore (v7x); on v5e/v6e a
    # single grid step is fine, so bt is sized purely from the VMEM budget.
    return bt, nc


def lowrank2d_forward(v, params, *, out_channels, rank, batch_tile=None,
                      n_chunk=None, compute_dtype=jnp.bfloat16,
                      vmem_budget_bytes=24 << 20):
    """Pallas-TPU forward of LowRank2d.  v: (B, N=s*s, Cin) -> (B, N, Cout)."""
    B, N, Cin = v.shape
    KW = params["W1_phi"].shape[0]
    O, I, R = out_channels, Cin, rank
    OIR = O * I * R
    cdt = jnp.dtype(compute_dtype)

    bt_auto, nc_auto = _pick_tiles(B, N, Cin, KW, OIR, O, cdt.itemsize, vmem_budget_bytes)
    bt = batch_tile if batch_tile is not None else bt_auto
    nc = n_chunk if n_chunk is not None else nc_auto
    assert B % bt == 0, "batch must be divisible by batch_tile"
    assert N % nc == 0 and (nc == N or nc % 128 == 0), \
        "n_chunk must divide N and be a multiple of 128 (or equal N)"
    nk = N // nc

    # Lane-dense transposed layout: (B, Cin, N) keeps N on the 128-lane axis.
    vt = jnp.transpose(v, (0, 2, 1)).astype(cdt)

    # Weights in their natural transposed-compute layout (== torch Linear layout):
    #   hT = relu(W1 @ vT + b1[:, None]);  phiT/psiT = W2 @ hT + b2[:, None]
    w1p = params["W1_phi"].astype(cdt); b1p = params["b1_phi"][:, None]
    w2p = params["W2_phi"].astype(cdt); b2p = params["b2_phi"][:, None]
    w1s = params["W1_psi"].astype(cdt); b1s = params["b1_psi"][:, None]
    w2s = params["W2_psi"].astype(cdt); b2s = params["b2_psi"][:, None]

    # 0/1 selectors over the flattened c = o*I*R + i*R + r column index
    # (matches the PyTorch reshape(batch, n, out_channels, in_channels, rank)).
    cols = jnp.arange(OIR)
    E = (((cols // R) % I)[None, :] == jnp.arange(I)[:, None]).astype(jnp.float32)   # (Cin,  OIR)
    GT = ((cols // (I * R))[None, :] == jnp.arange(O)[:, None]).astype(jnp.float32)  # (Cout, OIR)

    grid = (B // bt, nk)
    v_spec = pl.BlockSpec((bt, Cin, nc), lambda b, k: (b, 0, k))
    a_spec = pl.BlockSpec((1, bt, OIR), lambda b, k: (b, 0, 0))

    # Explicit scoped-VMEM limit sized from an estimate (keep headroom for v7x's 64 MiB).
    est = (2 * bt * Cin * nc * cdt.itemsize                      # double-buffered v block
           + 2 * (bt * OIR + bt * O * nc) * 4                    # a / out blocks
           + (KW * Cin + OIR * KW) * cdt.itemsize + (KW + OIR) * 4
           + (Cin + O) * OIR * 4                                 # selectors
           + 4 * nc * (KW + OIR + O) + 4 * Cin * OIR)            # per-batch live temporaries
    vmem_limit = int(min(48 << 20, max(24 << 20, 2 * est)))

    flops_a = 2 * B * N * (Cin * KW + KW * OIR + Cin * OIR)
    flops_b = 2 * B * N * (Cin * KW + KW * OIR + O * OIR)
    w_bytes = (KW * Cin + OIR * KW) * cdt.itemsize + (KW + OIR) * 4
    bytes_a = vt.size * cdt.itemsize + B * OIR * 4 + w_bytes + Cin * OIR * 4
    bytes_b = vt.size * cdt.itemsize + B * OIR * 4 + B * O * N * 4 + w_bytes + O * OIR * 4

    def run(single_buffer):
        def cspec(shape):
            zeros = (0,) * len(shape)
            if single_buffer and hasattr(pl, "Buffered"):
                # Constant blocks: index_map never changes -> double-buffering only wastes VMEM.
                return pl.BlockSpec(shape, lambda *_: zeros, pipeline_mode=pl.Buffered(1))
            return pl.BlockSpec(shape, lambda *_: zeros)

        # ---- pass A: psi MLP + contraction over N, accumulated across N-chunks ----
        a = pl.pallas_call(
            partial(_psi_accum_kernel, bt=bt, cdt=cdt),
            out_shape=jax.ShapeDtypeStruct((B // bt, bt, OIR), jnp.float32),
            grid=grid,
            in_specs=[v_spec,
                      cspec((KW, Cin)), cspec((KW, 1)),
                      cspec((OIR, KW)), cspec((OIR, 1)),
                      cspec((Cin, OIR))],
            out_specs=a_spec,
            compiler_params=pltpu.CompilerParams(
                dimension_semantics=("parallel", "arbitrary"),
                vmem_limit_bytes=vmem_limit),
            cost_estimate=pl.CostEstimate(flops=flops_a, transcendentals=0,
                                          bytes_accessed=bytes_a),
        )(vt, w1s, b1s, w2s, b2s, E)

        # ---- pass B: phi MLP + output contraction, lane-dense (bt*Cout, nc) slab ----
        out3 = pl.pallas_call(
            partial(_phi_out_kernel, bt=bt, cout=O, cdt=cdt),
            out_shape=jax.ShapeDtypeStruct((B // bt, bt * O, N), jnp.float32),
            grid=grid,
            in_specs=[v_spec, a_spec,
                      cspec((KW, Cin)), cspec((KW, 1)),
                      cspec((OIR, KW)), cspec((OIR, 1)),
                      cspec((O, OIR))],
            out_specs=pl.BlockSpec((1, bt * O, nc), lambda b, k: (b, 0, k)),
            compiler_params=pltpu.CompilerParams(
                dimension_semantics=("parallel", "parallel"),
                vmem_limit_bytes=vmem_limit),
            cost_estimate=pl.CostEstimate(flops=flops_b, transcendentals=0,
                                          bytes_accessed=bytes_b),
        )(vt, a, w1p, b1p, w2p, b2p, GT)
        return out3

    try:
        out3 = run(single_buffer=True)
    except Exception:   # fall back if pipeline_mode=Buffered(1) is rejected by this jax version
        out3 = run(single_buffer=False)

    # (B//bt, bt*Cout, N) -> (B, Cout, N) -> (B, N, Cout)
    out = out3.reshape(B // bt, bt, O, N).reshape(B, O, N)
    return jnp.transpose(out, (0, 2, 1))


def lowrank2d_reference(v, params, *, out_channels, rank):
    """Pure-JAX reference mirroring the PyTorch forward (no 1/n factor, as in the source)."""
    B, N, Cin = v.shape

    def mlp(x, W1, b1, W2, b2):
        h = jnp.maximum(x @ W1.T + b1, 0.0)
        return h @ W2.T + b2

    phi = mlp(v, params["W1_phi"], params["b1_phi"], params["W2_phi"], params["b2_phi"])
    psi = mlp(v, params["W1_psi"], params["b1_psi"], params["W2_psi"], params["b2_psi"])
    phi = phi.reshape(B, N, out_channels, Cin, rank)
    psi = psi.reshape(B, N, out_channels, Cin, rank)
    return jnp.einsum('bnoir,bni,bmoir->bmo', psi, v, phi)


if __name__ == "__main__":
    batch = 8
    in_channels = 4
    out_channels = 4
    s = 16                     # N = s*s = 256  (two 128-lane chunks when n_chunk=128)
    ker_width = 16
    rank = 4                   # OIR = in*out*rank = 64

    key = jax.random.PRNGKey(0)
    k_param, k_v = jax.random.split(key)
    params = make_params(k_param, in_channels, out_channels, ker_width, rank)
    v = jax.random.normal(k_v, (batch, s * s, in_channels), dtype=jnp.float32)

    ref = lowrank2d_reference(v, params, out_channels=out_channels, rank=rank)

    # f32 path with explicit tiles exercising both grid axes (batch fold + N-chunk accumulation).
    out = lowrank2d_forward(v, params, out_channels=out_channels, rank=rank,
                            batch_tile=2, n_chunk=128, compute_dtype=jnp.float32)
    out = jax.block_until_ready(out)
    np.testing.assert_allclose(np.asarray(out), np.asarray(ref), rtol=1e-3, atol=1e-3)

    # Default path: auto-sized tiles, bf16 MXU operands (f32 accumulation / elementwise).
    out_bf16 = jax.block_until_ready(
        lowrank2d_forward(v, params, out_channels=out_channels, rank=rank))
    ref_np = np.asarray(ref)
    rel = (np.max(np.abs(np.asarray(out_bf16) - ref_np)) / max(np.max(np.abs(ref_np)), 1e-6))
    assert rel < 5e-2, f"bf16 path relative error too large: {rel}"

    print("KERNEL_OK")
</pallas_src>

<mosaic_0001>
module attributes {stable_mosaic.version = 11 : i64} {
  func.func @_psi_accum_kernel(%arg0: i32, %arg1: i32, %arg2: memref<2x4x128xf32, #tpu.memory_space<vmem>>, %arg3: memref<16x4xf32, #tpu.memory_space<vmem>>, %arg4: memref<16x1xf32, #tpu.memory_space<vmem>>, %arg5: memref<64x16xf32, #tpu.memory_space<vmem>>, %arg6: memref<64x1xf32, #tpu.memory_space<vmem>>, %arg7: memref<4x64xf32, #tpu.memory_space<vmem>>, %arg8: memref<1x2x64xf32, #tpu.memory_space<vmem>>) attributes {dimension_semantics = [#tpu.dimension_semantics<parallel>, #tpu.dimension_semantics<arbitrary>], iteration_bounds = array<i64: 4, 2>, scalar_prefetch = 0 : i64, scratch_operands = 0 : i64, tpu.core_type = #tpu.core_type<tc>, window_params = [{transform_indices = @transform_0, window_bounds = array<i64: 2, 4, 128>}, {pipeline_mode = #tpu.pipeline_mode<synchronous>, transform_indices = @transform_1, window_bounds = array<i64: 16, 4>}, {pipeline_mode = #tpu.pipeline_mode<synchronous>, transform_indices = @transform_2, window_bounds = array<i64: 16, 1>}, {pipeline_mode = #tpu.pipeline_mode<synchronous>, transform_indices = @transform_3, window_bounds = array<i64: 64, 16>}, {pipeline_mode = #tpu.pipeline_mode<synchronous>, transform_indices = @transform_4, window_bounds = array<i64: 64, 1>}, {pipeline_mode = #tpu.pipeline_mode<synchronous>, transform_indices = @transform_5, window_bounds = array<i64: 4, 64>}, {transform_indices = @transform_6, window_bounds = array<i64: 1, 2, 64>}]} {
    %c0_i32 = arith.constant 0 : i32
    %0 = arith.cmpi eq, %arg1, %c0_i32 : i32
    %1 = arith.extui %0 : i1 to i32
    %c0_i32_0 = arith.constant 0 : i32
    %2 = arith.cmpi ne, %1, %c0_i32_0 : i32
    scf.if %2 {
      %cst_32 = arith.constant 0.000000e+00 : f32
      %54 = vector.broadcast %cst_32 : f32 to vector<1x2x64xf32>
      %c0_33 = arith.constant 0 : index
      %c0_34 = arith.constant 0 : index
      %c0_35 = arith.constant 0 : index
      %55 = vector.load %arg8[%c0_33, %c0_34, %c0_35] : memref<1x2x64xf32, #tpu.memory_space<vmem>>, vector<1x2x64xf32>
      tpu.vector_store %arg8[%c0_33, %c0_34, %c0_35], %54 {strides = array<i32>} : memref<1x2x64xf32, #tpu.memory_space<vmem>>, vector<1x2x64xf32>,
    } else {
    }
    %c0 = arith.constant 0 : index
    %c0_1 = arith.constant 0 : index
    %3 = vector.load %arg3[%c0, %c0_1] : memref<16x4xf32, #tpu.memory_space<vmem>>, vector<16x4xf32>
    %c0_2 = arith.constant 0 : index
    %c0_3 = arith.constant 0 : index
    %4 = vector.load %arg4[%c0_2, %c0_3] : memref<16x1xf32, #tpu.memory_space<vmem>>, vector<16x1xf32>
    %c0_4 = arith.constant 0 : index
    %c0_5 = arith.constant 0 : index
    %5 = vector.load %arg5[%c0_4, %c0_5] : memref<64x16xf32, #tpu.memory_space<vmem>>, vector<64x16xf32>
    %c0_6 = arith.constant 0 : index
    %c0_7 = arith.constant 0 : index
    %6 = vector.load %arg6[%c0_6, %c0_7] : memref<64x1xf32, #tpu.memory_space<vmem>>, vector<64x1xf32>
    %c0_8 = arith.constant 0 : index
    %c0_9 = arith.constant 0 : index
    %7 = vector.load %arg7[%c0_8, %c0_9] : memref<4x64xf32, #tpu.memory_space<vmem>>, vector<4x64xf32>
    %c0_i32_10 = arith.constant 0 : i32
    %8 = arith.index_cast %c0_i32_10 : i32 to index
    %c0_11 = arith.constant 0 : index
    %c0_12 = arith.constant 0 : index
    %9 = vector.load %arg2[%8, %c0_11, %c0_12] : memref<2x4x128xf32, #tpu.memory_space<vmem>>, vector<1x4x128xf32>
    %10 = vector.shape_cast %9 : vector<1x4x128xf32> to vector<4x128xf32>
    %cst = arith.constant dense<0.000000e+00> : vector<16x128xf32>
    %11 = tpu.matmul %3, %10, %cst {dimension_numbers = #tpu.dot_dimension_numbers<[1], [0], [0], [1], [0, 0, 1, 1], [], []>} : vector<16x4xf32>, vector<4x128xf32>, vector<16x128xf32> -> vector<16x128xf32>
    %12 = vector.broadcast %4 : vector<16x1xf32> to vector<16x128xf32>
    %13 = arith.addf %11, %12 : vector<16x128xf32>
    %cst_13 = arith.constant 0.000000e+00 : f32
    %14 = vector.broadcast %cst_13 : f32 to vector<16x128xf32>
    %15 = arith.maximumf %13, %14 : vector<16x128xf32>
    %cst_14 = arith.constant dense<0.000000e+00> : vector<64x128xf32>
    %16 = tpu.matmul %5, %15, %cst_14 {dimension_numbers = #tpu.dot_dimension_numbers<[1], [0], [0], [1], [0, 0, 1, 1], [], []>} : vector<64x16xf32>, vector<16x128xf32>, vector<64x128xf32> -> vector<64x128xf32>
    %17 = vector.broadcast %6 : vector<64x1xf32> to vector<64x128xf32>
    %18 = arith.addf %16, %17 : vector<64x128xf32>
    %cst_15 = arith.constant dense<0.000000e+00> : vector<4x64xf32>
    %19 = tpu.matmul %10, %18, %cst_15 {dimension_numbers = #tpu.dot_dimension_numbers<[1], [1], [0], [0], [0, 0, 1, 0], [], []>} : vector<4x128xf32>, vector<64x128xf32>, vector<4x64xf32> -> vector<4x64xf32>
    %20 = arith.mulf %19, %7 : vector<4x64xf32>
    %cst_16 = arith.constant dense<0.000000e+00> : vector<64xf32>
    %21 = vector.multi_reduction <add>, %20, %cst_16 [0] : vector<4x64xf32> to vector<64xf32>
    %22 = vector.shape_cast %21 : vector<64xf32> to vector<1x64xf32>
    %c0_17 = arith.constant 0 : index
    %23 = arith.index_cast %c0_i32_10 : i32 to index
    %c0_18 = arith.constant 0 : index
    %24 = vector.load %arg8[%c0_17, %23, %c0_18] : memref<1x2x64xf32, #tpu.memory_space<vmem>>, vector<1x1x64xf32>
    %25 = vector.shape_cast %24 : vector<1x1x64xf32> to vector<1x64xf32>
    %26 = arith.addf %25, %22 : vector<1x64xf32>
    %c0_19 = arith.constant 0 : index
    %27 = arith.index_cast %c0_i32_10 : i32 to index
    %c0_20 = arith.constant 0 : index
    %28 = vector.load %arg8[%c0_19, %27, %c0_20] : memref<1x2x64xf32, #tpu.memory_space<vmem>>, vector<1x1x64xf32>
    %29 = vector.shape_cast %28 : vector<1x1x64xf32> to vector<1x64xf32>
    %30 = vector.shape_cast %26 : vector<1x64xf32> to vector<1x1x64xf32>
    tpu.vector_store %arg8[%c0_19, %27, %c0_20], %30 {strides = array<i32>} : memref<1x2x64xf32, #tpu.memory_space<vmem>>, vector<1x1x64xf32>,
    %c1_i32 = arith.constant 1 : i32
    %31 = arith.index_cast %c1_i32 : i32 to index
    %c0_21 = arith.constant 0 : index
    %c0_22 = arith.constant 0 : index
    %32 = vector.load %arg2[%31, %c0_21, %c0_22] : memref<2x4x128xf32, #tpu.memory_space<vmem>>, vector<1x4x128xf32>
    %33 = vector.shape_cast %32 : vector<1x4x128xf32> to vector<4x128xf32>
    %cst_23 = arith.constant dense<0.000000e+00> : vector<16x128xf32>
    %34 = tpu.matmul %3, %33, %cst_23 {dimension_numbers = #tpu.dot_dimension_numbers<[1], [0], [0], [1], [0, 0, 1, 1], [], []>} : vector<16x4xf32>, vector<4x128xf32>, vector<16x128xf32> -> vector<16x128xf32>
    %35 = vector.broadcast %4 : vector<16x1xf32> to vector<16x128xf32>
    %36 = arith.addf %34, %35 : vector<16x128xf32>
    %cst_24 = arith.constant 0.000000e+00 : f32
    %37 = vector.broadcast %cst_24 : f32 to vector<16x128xf32>
    %38 = arith.maximumf %36, %37 : vector<16x128xf32>
    %cst_25 = arith.constant dense<0.000000e+00> : vector<64x128xf32>
    %39 = tpu.matmul %5, %38, %cst_25 {dimension_numbers = #tpu.dot_dimension_numbers<[1], [0], [0], [1], [0, 0, 1, 1], [], []>} : vector<64x16xf32>, vector<16x128xf32>, vector<64x128xf32> -> vector<64x128xf32>
    %40 = vector.broadcast %6 : vector<64x1xf32> to vector<64x128xf32>
    %41 = arith.addf %39, %40 : vector<64x128xf32>
    %cst_26 = arith.constant dense<0.000000e+00> : vector<4x64xf32>
    %42 = tpu.matmul %33, %41, %cst_26 {dimension_numbers = #tpu.dot_dimension_numbers<[1], [1], [0], [0], [0, 0, 1, 0], [], []>} : vector<4x128xf32>, vector<64x128xf32>, vector<4x64xf32> -> vector<4x64xf32>
    %43 = arith.mulf %42, %7 : vector<4x64xf32>
    %cst_27 = arith.constant dense<0.000000e+00> : vector<64xf32>
    %44 = vector.multi_reduction <add>, %43, %cst_27 [0] : vector<4x64xf32> to vector<64xf32>
    %45 = vector.shape_cast %44 : vector<64xf32> to vector<1x64xf32>
    %c0_28 = arith.constant 0 : index
    %46 = arith.index_cast %c1_i32 : i32 to index
    %c0_29 = arith.constant 0 : index
    %47 = vector.load %arg8[%c0_28, %46, %c0_29] : memref<1x2x64xf32, #tpu.memory_space<vmem>>, vector<1x1x64xf32>
    %48 = vector.shape_cast %47 : vector<1x1x64xf32> to vector<1x64xf32>
    %49 = arith.addf %48, %45 : vector<1x64xf32>
    %c0_30 = arith.constant 0 : index
    %50 = arith.index_cast %c1_i32 : i32 to index
    %c0_31 = arith.constant 0 : index
    %51 = vector.load %arg8[%c0_30, %50, %c0_31] : memref<1x2x64xf32, #tpu.memory_space<vmem>>, vector<1x1x64xf32>
    %52 = vector.shape_cast %51 : vector<1x1x64xf32> to vector<1x64xf32>
    %53 = vector.shape_cast %49 : vector<1x64xf32> to vector<1x1x64xf32>
    tpu.vector_store %arg8[%c0_30, %50, %c0_31], %53 {strides = array<i32>} : memref<1x2x64xf32, #tpu.memory_space<vmem>>, vector<1x1x64xf32>,
    %c2_i32 = arith.constant 2 : i32
    return
  }
  func.func @transform_0(%arg0: i32, %arg1: i32) -> (i32, i32, i32) {
    %c0_i32 = arith.constant 0 : i32
    %c0_i32_0 = arith.constant 0 : i32
    return %arg0, %c0_i32, %arg1 : i32, i32, i32
  }
  func.func @transform_1(%arg0: i32, %arg1: i32) -> (i32, i32) {
    %c0_i32 = arith.constant 0 : i32
    %c0_i32_0 = arith.constant 0 : i32
    %c0_i32_1 = arith.constant 0 : i32
    return %c0_i32, %c0_i32_0 : i32, i32
  }
  func.func @transform_2(%arg0: i32, %arg1: i32) -> (i32, i32) {
    %c0_i32 = arith.constant 0 : i32
    %c0_i32_0 = arith.constant 0 : i32
    %c0_i32_1 = arith.constant 0 : i32
    return %c0_i32, %c0_i32_0 : i32, i32
  }
  func.func @transform_3(%arg0: i32, %arg1: i32) -> (i32, i32) {
    %c0_i32 = arith.constant 0 : i32
    %c0_i32_0 = arith.constant 0 : i32
    %c0_i32_1 = arith.constant 0 : i32
    return %c0_i32, %c0_i32_0 : i32, i32
  }
  func.func @transform_4(%arg0: i32, %arg1: i32) -> (i32, i32) {
    %c0_i32 = arith.constant 0 : i32
    %c0_i32_0 = arith.constant 0 : i32
    %c0_i32_1 = arith.constant 0 : i32
    return %c0_i32, %c0_i32_0 : i32, i32
  }
  func.func @transform_5(%arg0: i32, %arg1: i32) -> (i32, i32) {
    %c0_i32 = arith.constant 0 : i32
    %c0_i32_0 = arith.constant 0 : i32
    %c0_i32_1 = arith.constant 0 : i32
    return %c0_i32, %c0_i32_0 : i32, i32
  }
  func.func @transform_6(%arg0: i32, %arg1: i32) -> (i32, i32, i32) {
    %c0_i32 = arith.constant 0 : i32
    %c0_i32_0 = arith.constant 0 : i32
    %c0_i32_1 = arith.constant 0 : i32
    return %arg0, %c0_i32, %c0_i32_0 : i32, i32, i32
  }
}

module attributes {stable_mosaic.version = 11 : i64} {
  func.func @_psi_accum_kernel(%arg0: i32, %arg1: i32, %arg2: memref<2x4x128xf32, #tpu.memory_space<vmem>>, %arg3: memref<16x4xf32, #tpu.memory_space<vmem>>, %arg4: memref<16x1xf32, #tpu.memory_space<vmem>>, %arg5: memref<64x16xf32, #tpu.memory_space<vmem>>, %arg6: memref<64x1xf32, #tpu.memory_space<vmem>>, %arg7: memref<4x64xf32, #tpu.memory_space<vmem>>, %arg8: memref<1x2x64xf32, #tpu.memory_space<vmem>>) attributes {dimension_semantics = [#tpu.dimension_semantics<parallel>, #tpu.dimension_semantics<arbitrary>], iteration_bounds = array<i64: 4, 2>, scalar_prefetch = 0 : i64, scratch_operands = 0 : i64, tpu.core_type = #tpu.core_type<tc>, window_params = [{transform_indices = @transform_0, window_bounds = array<i64: 2, 4, 128>}, {pipeline_mode = #tpu.pipeline_mode<synchronous>, transform_indices = @transform_1, window_bounds = array<i64: 16, 4>}, {pipeline_mode = #tpu.pipeline_mode<synchronous>, transform_indices = @transform_2, window_bounds = array<i64: 16, 1>}, {pipeline_mode = #tpu.pipeline_mode<synchronous>, transform_indices = @transform_3, window_bounds = array<i64: 64, 16>}, {pipeline_mode = #tpu.pipeline_mode<synchronous>, transform_indices = @transform_4, window_bounds = array<i64: 64, 1>}, {pipeline_mode = #tpu.pipeline_mode<synchronous>, transform_indices = @transform_5, window_bounds = array<i64: 4, 64>}, {transform_indices = @transform_6, window_bounds = array<i64: 1, 2, 64>}]} {
    %c0_i32 = arith.constant 0 : i32
    %0 = arith.cmpi eq, %arg1, %c0_i32 : i32
    %1 = arith.extui %0 : i1 to i32
    %c0_i32_0 = arith.constant 0 : i32
    %2 = arith.cmpi ne, %1, %c0_i32_0 : i32
    scf.if %2 {
      %cst_32 = arith.constant 0.000000e+00 : f32
      %54 = vector.broadcast %cst_32 : f32 to vector<1x2x64xf32>
      %c0_33 = arith.constant 0 : index
      %c0_34 = arith.constant 0 : index
      %c0_35 = arith.constant 0 : index
      %55 = vector.load %arg8[%c0_33, %c0_34, %c0_35] : memref<1x2x64xf32, #tpu.memory_space<vmem>>, vector<1x2x64xf32>
      tpu.vector_store %arg8[%c0_33, %c0_34, %c0_35], %54 {strides = array<i32>} : memref<1x2x64xf32, #tpu.memory_space<vmem>>, vector<1x2x64xf32>,
    } else {
    }
    %c0 = arith.constant 0 : index
    %c0_1 = arith.constant 0 : index
    %3 = vector.load %arg3[%c0, %c0_1] : memref<16x4xf32, #tpu.memory_space<vmem>>, vector<16x4xf32>
    %c0_2 = arith.constant 0 : index
    %c0_3 = arith.constant 0 : index
    %4 = vector.load %arg4[%c0_2, %c0_3] : memref<16x1xf32, #tpu.memory_space<vmem>>, vector<16x1xf32>
    %c0_4 = arith.constant 0 : index
    %c0_5 = arith.constant 0 : index
    %5 = vector.load %arg5[%c0_4, %c0_5] : memref<64x16xf32, #tpu.memory_space<vmem>>, vector<64x16xf32>
    %c0_6 = arith.constant 0 : index
    %c0_7 = arith.constant 0 : index
    %6 = vector.load %arg6[%c0_6, %c0_7] : memref<64x1xf32, #tpu.memory_space<vmem>>, vector<64x1xf32>
    %c0_8 = arith.constant 0 : index
    %c0_9 = arith.constant 0 : index
    %7 = vector.load %arg7[%c0_8, %c0_9] : memref<4x64xf32, #tpu.memory_space<vmem>>, vector<4x64xf32>
    %c0_i32_10 = arith.constant 0 : i32
    %8 = arith.index_cast %c0_i32_10 : i32 to index
    %c0_11 = arith.constant 0 : index
    %c0_12 = arith.constant 0 : index
    %9 = vector.load %arg2[%8, %c0_11, %c0_12] : memref<2x4x128xf32, #tpu.memory_space<vmem>>, vector<1x4x128xf32>
    %10 = vector.shape_cast %9 : vector<1x4x128xf32> to vector<4x128xf32>
    %cst = arith.constant dense<0.000000e+00> : vector<16x128xf32>
    %11 = tpu.matmul %3, %10, %cst {dimension_numbers = #tpu.dot_dimension_numbers<[1], [0], [0], [1], [0, 0, 1, 1], [], []>} : vector<16x4xf32>, vector<4x128xf32>, vector<16x128xf32> -> vector<16x128xf32>
    %12 = vector.broadcast %4 : vector<16x1xf32> to vector<16x128xf32>
    %13 = arith.addf %11, %12 : vector<16x128xf32>
    %cst_13 = arith.constant 0.000000e+00 : f32
    %14 = vector.broadcast %cst_13 : f32 to vector<16x128xf32>
    %15 = arith.maximumf %13, %14 : vector<16x128xf32>
    %cst_14 = arith.constant dense<0.000000e+00> : vector<64x128xf32>
    %16 = tpu.matmul %5, %15, %cst_14 {dimension_numbers = #tpu.dot_dimension_numbers<[1], [0], [0], [1], [0, 0, 1, 1], [], []>} : vector<64x16xf32>, vector<16x128xf32>, vector<64x128xf32> -> vector<64x128xf32>
    %17 = vector.broadcast %6 : vector<64x1xf32> to vector<64x128xf32>
    %18 = arith.addf %16, %17 : vector<64x128xf32>
    %cst_15 = arith.constant dense<0.000000e+00> : vector<4x64xf32>
    %19 = tpu.matmul %10, %18, %cst_15 {dimension_numbers = #tpu.dot_dimension_numbers<[1], [1], [0], [0], [0, 0, 1, 0], [], []>} : vector<4x128xf32>, vector<64x128xf32>, vector<4x64xf32> -> vector<4x64xf32>
    %20 = arith.mulf %19, %7 : vector<4x64xf32>
    %cst_16 = arith.constant dense<0.000000e+00> : vector<64xf32>
    %21 = vector.multi_reduction <add>, %20, %cst_16 [0] : vector<4x64xf32> to vector<64xf32>
    %22 = vector.shape_cast %21 : vector<64xf32> to vector<1x64xf32>
    %c0_17 = arith.constant 0 : index
    %23 = arith.index_cast %c0_i32_10 : i32 to index
    %c0_18 = arith.constant 0 : index
    %24 = vector.load %arg8[%c0_17, %23, %c0_18] : memref<1x2x64xf32, #tpu.memory_space<vmem>>, vector<1x1x64xf32>
    %25 = vector.shape_cast %24 : vector<1x1x64xf32> to vector<1x64xf32>
    %26 = arith.addf %25, %22 : vector<1x64xf32>
    %c0_19 = arith.constant 0 : index
    %27 = arith.index_cast %c0_i32_10 : i32 to index
    %c0_20 = arith.constant 0 : index
    %28 = vector.load %arg8[%c0_19, %27, %c0_20] : memref<1x2x64xf32, #tpu.memory_space<vmem>>, vector<1x1x64xf32>
    %29 = vector.shape_cast %28 : vector<1x1x64xf32> to vector<1x64xf32>
    %30 = vector.shape_cast %26 : vector<1x64xf32> to vector<1x1x64xf32>
    tpu.vector_store %arg8[%c0_19, %27, %c0_20], %30 {strides = array<i32>} : memref<1x2x64xf32, #tpu.memory_space<vmem>>, vector<1x1x64xf32>,
    %c1_i32 = arith.constant 1 : i32
    %31 = arith.index_cast %c1_i32 : i32 to index
    %c0_21 = arith.constant 0 : index
    %c0_22 = arith.constant 0 : index
    %32 = vector.load %arg2[%31, %c0_21, %c0_22] : memref<2x4x128xf32, #tpu.memory_space<vmem>>, vector<1x4x128xf32>
    %33 = vector.shape_cast %32 : vector<1x4x128xf32> to vector<4x128xf32>
    %cst_23 = arith.constant dense<0.000000e+00> : vector<16x128xf32>
    %34 = tpu.matmul %3, %33, %cst_23 {dimension_numbers = #tpu.dot_dimension_numbers<[1], [0], [0], [1], [0, 0, 1, 1], [], []>} : vector<16x4xf32>, vector<4x128xf32>, vector<16x128xf32> -> vector<16x128xf32>
    %35 = vector.broadcast %4 : vector<16x1xf32> to vector<16x128xf32>
    %36 = arith.addf %34, %35 : vector<16x128xf32>
    %cst_24 = arith.constant 0.000000e+00 : f32
    %37 = vector.broadcast %cst_24 : f32 to vector<16x128xf32>
    %38 = arith.maximumf %36, %37 : vector<16x128xf32>
    %cst_25 = arith.constant dense<0.000000e+00> : vector<64x128xf32>
    %39 = tpu.matmul %5, %38, %cst_25 {dimension_numbers = #tpu.dot_dimension_numbers<[1], [0], [0], [1], [0, 0, 1, 1], [], []>} : vector<64x16xf32>, vector<16x128xf32>, vector<64x128xf32> -> vector<64x128xf32>
    %40 = vector.broadcast %6 : vector<64x1xf32> to vector<64x128xf32>
    %41 = arith.addf %39, %40 : vector<64x128xf32>
    %cst_26 = arith.constant dense<0.000000e+00> : vector<4x64xf32>
    %42 = tpu.matmul %33, %41, %cst_26 {dimension_numbers = #tpu.dot_dimension_numbers<[1], [1], [0], [0], [0, 0, 1, 0], [], []>} : vector<4x128xf32>, vector<64x128xf32>, vector<4x64xf32> -> vector<4x64xf32>
    %43 = arith.mulf %42, %7 : vector<4x64xf32>
    %cst_27 = arith.constant dense<0.000000e+00> : vector<64xf32>
    %44 = vector.multi_reduction <add>, %43, %cst_27 [0] : vector<4x64xf32> to vector<64xf32>
    %45 = vector.shape_cast %44 : vector<64xf32> to vector<1x64xf32>
    %c0_28 = arith.constant 0 : index
    %46 = arith.index_cast %c1_i32 : i32 to index
    %c0_29 = arith.constant 0 : index
    %47 = vector.load %arg8[%c0_28, %46, %c0_29] : memref<1x2x64xf32, #tpu.memory_space<vmem>>, vector<1x1x64xf32>
    %48 = vector.shape_cast %47 : vector<1x1x64xf32> to vector<1x64xf32>
    %49 = arith.addf %48, %45 : vector<1x64xf32>
    %c0_30 = arith.constant 0 : index
    %50 = arith.index_cast %c1_i32 : i32 to index
    %c0_31 = arith.constant 0 : index
    %51 = vector.load %arg8[%c0_30, %50, %c0_31] : memref<1x2x64xf32, #tpu.memory_space<vmem>>, vector<1x1x64xf32>
    %52 = vector.shape_cast %51 : vector<1x1x64xf32> to vector<1x64xf32>
    %53 = vector.shape_cast %49 : vector<1x64xf32> to vector<1x1x64xf32>
    tpu.vector_store %arg8[%c0_30, %50, %c0_31], %53 {strides = array<i32>} : memref<1x2x64xf32, #tpu.memory_space<vmem>>, vector<1x1x64xf32>,
    %c2_i32 = arith.constant 2 : i32
    return
  }
  func.func @transform_0(%arg0: i32, %arg1: i32) -> (i32, i32, i32) {
    %c0_i32 = arith.constant 0 : i32
    %c0_i32_0 = arith.constant 0 : i32
    return %arg0, %c0_i32, %arg1 : i32, i32, i32
  }
  func.func @transform_1(%arg0: i32, %arg1: i32) -> (i32, i32) {
    %c0_i32 = arith.constant 0 : i32
    %c0_i32_0 = arith.constant 0 : i32
    %c0_i32_1 = arith.constant 0 : i32
    return %c0_i32, %c0_i32_0 : i32, i32
  }
  func.func @transform_2(%arg0: i32, %arg1: i32) -> (i32, i32) {
    %c0_i32 = arith.constant 0 : i32
    %c0_i32_0 = arith.constant 0 : i32
    %c0_i32_1 = arith.constant 0 : i32
    return %c0_i32, %c0_i32_0 : i32, i32
  }
  func.func @transform_3(%arg0: i32, %arg1: i32) -> (i32, i32) {
    %c0_i32 = arith.constant 0 : i32
    %c0_i32_0 = arith.constant 0 : i32
    %c0_i32_1 = arith.constant 0 : i32
    return %c0_i32, %c0_i32_0 : i32, i32
  }
  func.func @transform_4(%arg0: i32, %arg1: i32) -> (i32, i32) {
    %c0_i32 = arith.constant 0 : i32
    %c0_i32_0 = arith.constant 0 : i32
    %c0_i32_1 = arith.constant 0 : i32
    return %c0_i32, %c0_i32_0 : i32, i32
  }
  func.func @transform_5(%arg0: i32, %arg1: i32) -> (i32, i32) {
    %c0_i32 = arith.constant 0 : i32
    %c0_i32_0 = arith.constant 0 : i32
    %c0_i32_1 = arith.constant 0 : i32
    return %c0_i32, %c0_i32_0 : i32, i32
  }
  func.func @transform_6(%arg0: i32, %arg1: i32) -> (i32, i32, i32) {
    %c0_i32 = arith.constant 0 : i32
    %c0_i32_0 = arith.constant 0 : i32
    %c0_i32_1 = arith.constant 0 : i32
    return %arg0, %c0_i32, %c0_i32_0 : i32, i32, i32
  }
}

</mosaic_0001>

<bundles_post_ra>
// kernel: tpu_custom_call.1
= control target key start
LH: loop header
LB: loop body
LE: loop exit
PB: predicated region body
PF: predicated region fallthrough
CT: control target
= control target key end

     0   :  { %11 = vsyncpa [#allocation4], 0  ;;  %s1285_s0 = inlined_call_operand.vmem [shape: f32[8,4,256], index: 0, kind: input, shape index: {}]   ;;  %s1286_s1 = inlined_call_operand.vmem [shape: f32[16,4], index: 1, kind: input, shape index: {}]   ;;  %s1287_s2 = inlined_call_operand.vmem [shape: f32[16,1], index: 2, kind: input, shape index: {}]   ;;  %s1288_s3 = inlined_call_operand.vmem [shape: f32[64,16], index: 3, kind: input, shape index: {}]   ;;  %s1289_s4 = inlined_call_operand.vmem [shape: f32[64,1], index: 4, kind: input, shape index: {}]   ;;  %s1290_s5 = inlined_call_operand.vmem [shape: f32[4,64], index: 5, kind: input, shape index: {}]   ;;  %s1291_s6 = inlined_call_operand.hbm [shape: f32[4,2,64], index: 6, kind: output, shape index: {}]  }
   0x1   :  { %13 = vsyncpa [#allocation4 + $0x1], 0  ;;  %s1009_s21 = smov 0   ;;  %s1011_s22 = smov 0  }
   0x2   :  { %s1013_s23 = smov 0   ;;  %s1015_s24 = smov 0  }
   0x3   :  { %s1017_s25 = smov 0   ;;  %s1019_s26 = smov 0  }
   0x4   :  { %s1021_s27 = smov 0   ;;  %s1023_s28 = smov 0  }
   0x5   :  { %s1025_s29 = smov 0   ;;  %s1027_s30 = smov 0  }
   0x6 LB: > { %s724_s7 = sadd.s32 4294967295, %s970_s30   ;;  %s725_s8 = sadd.s32 4294967294, %s970_s30   ;;  %s970_s30 = sphi %s1027_s30, %s19_s30   ;;  %s966_s29 = sphi %s1025_s29, %s1311_s29   ;;  %s962_s28 = sphi %s1023_s28, %s1310_s28   ;;  %s958_s27 = sphi %s1021_s27, %s1309_s27   ;;  %s954_s26 = sphi %s1019_s26, %s1308_s26   ;;  %s950_s25 = sphi %s1017_s25, %s1307_s25   ;;  %s946_s24 = sphi %s1015_s24, %s1306_s24   ;;  %s942_s23 = sphi %s1013_s23, %s1305_s23   ;;  %s938_s22 = sphi %s1011_s22, %s1304_s22   ;;  %s934_s21 = sphi %s1009_s21, %s1303_s21  }
   0x7   : > { %s28_s9 = sadd.s32 1, %s962_s28  ;;  %s31_s10 = sadd.s32 1, %s966_s29 }
   0x8   : > { %p29_p0 = scmp.ge.s32.totalorder %s28_s9, 2  ;;  %s40_s11 = sadd.s32 1, %s950_s25 }
   0x9   : > { %p47_p1 = scmp.ne.s32.totalorder %s950_s25, %s946_s24  ;;  %p48_p2 = scmp.eq.s32.totalorder %s970_s30, 0 }
   0xa   : > { %s1313_s9 = smov (%p29_p0, %s28_s9), 0  ;;  %s1315_s10 = smov (!%p29_p0, %s31_s10), %s966_s29 }
   0xb   : > { %1295 = sst [smem:[#allocation6_spill]] %s1313_s9  ;;  %s36_s12 = ssub.s32 %s962_s28, %s1313_s9 }
   0xc   : > { %p1072_p3 = por %p48_p2, %p47_p1  ;;  %p33_p4 = scmp.ge.s32.totalorder %s1315_s10, 4 }
   0xd   : > { %s171_s14 = sadd.s32 1, %s942_s23  ;;  %p181_p5 = scmp.ne.s32.totalorder %s942_s23, %s938_s22 }
   0xe   : > { %p182_p6 = scmp.eq.s32.totalorder %s724_s7, 7  ;;  %s1317_s10 = smov (%p33_p4, %s1315_s10), 0 }
   0xf   : > { %1297 = sst [smem:[#allocation7_spill]] %s1317_s10  ;;  %p187_p8 = scmp.ne.s32.totalorder %s938_s22, %s934_s21 }
  0x10   : > { %p1081_p7 = por %p182_p6, %p181_p5  ;;  %s35_s16 = ssub.s32 %s966_s29, %s1317_s10 }
  0x11   : > { %p188_p9 = scmp.eq.s32.totalorder %s725_s8, 7  ;;  %s37_s17 = sor.u32 %s36_s12, %s35_s16 }
  0x12   : > { %p169_p10 = scmp.eq.s32.totalorder %s35_s16, 0  ;;  %p38_p11 = scmp.eq.s32.totalorder %s37_s17, 0 }
  0x13   : > { %p1089_p12 = por %p188_p9, %p187_p8  ;;  %p727_p13 = scmp.ge.s32.totalorder %s970_s30, 8 }
  0x14   : > { %s1094_s19 = scalar_select %p169_p10, %s942_s23, %s171_s14  }
  0x15   : > { %s1097_s20 = scalar_select %p38_p11, %s950_s25, %s40_s11  }
  0x16   : > { %219 = sbr.rel (%p727_p13) target bundleno = 35 (0x23), region = 36 }
  0x1b   : > { %222 = sbr.rel (!%p1072_p3) target bundleno = 35 (0x23), region = 40  ;;  %s224_s7 = sand.u32 (%p1072_p3), 1, %s950_s25  }
  0x1c   : > { %s763_s8 = sshll.u32 (%p1072_p3), %s966_s29, 2  ;;  %s728_s12 = sshll.u32 (%p1072_p3), %s224_s7, 3 }
  0x1d   : > { %s229_s16 = sadd.s32 (%p1072_p3), %s962_s28, %s763_s8  ;;  %s226_s11 = scalar_lea.vmem (%p1072_p3), [#allocation2], %s728_s12 }
  0x1e   : > { %s731_s17 = sshll.u32 (%p1072_p3), %s229_s16, 2 }
  0x1f   : > { %s231_s14 = scalar_lea.vmem (%p1072_p3), %s1285_s0, %s731_s17 }
  0x20   : > { %v248_v0 = vld [vmem:[%s231_s14] sm:$0xf]  ;;  %v250_v1 = vld [vmem:[%s231_s14 + $0x8] sm:$0xf] }
  0x21   : > { %249 = vst [vmem:[%s226_s11] sm:$0xf] %v248_v0 }
  0x22   : > { %251 = vst [vmem:[%s226_s11 + $0x4] sm:$0xf] %v250_v1 }
  0x23 PF: > { %p732_p0 = scmp.ge.s32.totalorder %s970_s30, 1  ;;  %p278_p1 = scmp.lt.s32.totalorder %s970_s30, 9 }
  0x25   : > { %p279_p2 = pnand %p732_p0, %p278_p1 }
  0x26   : > { %s285_s13 = sand.u32 (!%p279_p2), 1, %s946_s24   ;;  %s1294_s7 = sand.u32 (!%p279_p2), 1, %s938_s22  }
  0x27   : > { %282 = sbr.rel (%p279_p2) target bundleno = 738 (0x2e2), region = 81  ;;  %s1112_s9 = sshll.u32 (!%p279_p2), %s285_s13, 3 }
  0x28   : > { %s734_s10 = sshll.u32 (!%p279_p2), %s1294_s7, 1  ;;  %s287_s8 = scalar_lea.vmem (!%p279_p2), [#allocation2], %s1112_s9 }
  0x29   : > { %s1117_s12 = scalar_lea.vmem (!%p279_p2), [#allocation3], %s734_s10  ;;  %p735_p3 = scmp.ne.s32.totalorder (!%p279_p2), %s954_s26, 0 }
  0x2c   : > { %318 = sbr.rel (%p735_p3) target bundleno = 51 (0x33), region = 89 }
  0x31   : > { %vm319_vm0 = vcmask 517120   ;;  %v972_v2 = vmov 0.0  }
  0x32   : > { %320 = vst.msk [vmem:[%s1117_s12] sm:$0x3] %vm319_vm0, %v972_v2 }
  0x33 PF: > { %v1123_v3 = vld [vmem:[%s287_s8] sm:$0xf]  ;;  %vm360_vm1 = vcmask 1043456   ;;  %v973_v6 = vmov 0   ;;  %vm353_vm2 = vcmask 31744   ;;  %v336_v9 = vld [vmem:[%s1289_s4 + $0x18] sm:$0xff] }
  0x34   : > { %v324_v4 = vld [vmem:[%s1287_s2 + $0x8] sm:$0xff]  ;;  %v321_v5 = vld [vmem:[%s1286_s1] sm:$0xff]  ;;  %857 = vset.pattern.permute.xlu0 %v973_v6  ;;  %736 = vmatpush.msk.msra.mxu0 %vm360_vm1, %v1123_v3  ;;  %v340_v11 = vld [vmem:[%s1289_s4 + $0x38] sm:$0xff]  ;;  %vm429_vm3 = vcmask 130048   ;;  %vm516_vm4 = vcmask 519168   ;;  %vm526_vm5 = vcmask 516096  }
  0x35   : > { %350 = vperm.xlu0 %857, %v324_v4   ;;  %737 = vmatmul.msk.f32.vlgmr.msra.gmra.mxu0 %vm353_vm2, %v321_v5  ;;  %v323_v7 = vld [vmem:[%s1287_s2] sm:$0xff]  ;;  %v322_v8 = vld [vmem:[%s1286_s1 + $0x8] sm:$0xff]  ;;  %v339_v14 = vld [vmem:[%s1289_s4 + $0x30] sm:$0xff]  ;;  %s760_s7 = sshll.u32 %s958_s27, 1  ;;  %s643_s13 = sshll.u32 %s1117_s12, 4  ;;  %s644_s13 = int_to_ptr.vmem [resolvable:$true] %s643_s13 }
  0x36   : > { %858 = vset.pattern.permute.xlu1 %v973_v6  ;;  %859 = vset.pattern.permute.xlu2 %v973_v6  ;;  %v333_v10 = vld [vmem:[%s1289_s4] sm:$0xff]  ;;  %v338_v17 = vld [vmem:[%s1289_s4 + $0x28] sm:$0xff]  ;;  %v335_v18 = vld [vmem:[%s1289_s4 + $0x10] sm:$0xff]  ;;  %s641_s11 = scalar_lea.hbm %s1291_s6, %s760_s7  ;;  %s1300_s24 = sand.u32 1, %s938_s22  }
  0x37   : > { %426 = vperm.xlu1 %858, %v340_v11   ;;  %416 = vperm.xlu2 %859, %v338_v17   ;;  %v325_v23 = vld [vmem:[%s1288_s3] sm:$0xff]  ;;  %v1165_v24 = vld [vmem:[%s1288_s3 + $0x38] sm:$0xff]  ;;  %v326_v27 = vld [vmem:[%s1288_s3 + $0x8] sm:$0xff]  ;;  %s645_s10 = sshll.u32 %s641_s11, 4  ;;  %s631_s16 = scalar_lea.sflag [#allocation4], %s1300_s24  ;;  %s646_s10 = int_to_ptr.hbm [resolvable:$true] %s645_s10 }
  0x38   : > { %v1169_v25 = vld [vmem:[%s287_s8 + $0x4] sm:$0xf]  ;;  %v327_v29 = vld [vmem:[%s1288_s3 + $0x10] sm:$0xff]  ;;  %v328_v30 = vld [vmem:[%s1288_s3 + $0x18] sm:$0xff]  ;;  %s874_s27 = sshra.s32 %s646_s10, 4  ;;  %s880_s7 = scalar_lea.hbm %s1291_s6, 8  ;;  %s875_s27 = int_to_ptr.hbm [resolvable:$true] %s874_s27 }
  0x39   : > { %v337_v26 = vld [vmem:[%s1289_s4 + $0x20] sm:$0xff]  ;;  %v334_v28 = vld [vmem:[%s1289_s4 + $0x8] sm:$0xff]  ;;  %v331_v33 = vld [vmem:[%s1288_s3 + $0x30] sm:$0xff]  ;;  %s876_s9 = scalar_lea.hbm %s875_s27, 2  ;;  %p881_p8 = scmp.lt.s32.totalorder %s875_s27, %s1291_s6 }
  0x3a   : > { %v329_v31 = vld [vmem:[%s1288_s3 + $0x20] sm:$0xff]  ;;  %v330_v32 = vld [vmem:[%s1288_s3 + $0x28] sm:$0xff]  ;;  %p877_p4 = scmp.ne.s32.totalorder %s875_s27, %s876_s9  ;;  %p882_p9 = scmp.lt.s32.totalorder %s880_s7, %s876_s9 }
  0x3b   : > { %v341_v1 = vld [vmem:[%s1290_s5] sm:$0xf] }
  0x3c   : > { %p878_p5 = pnand %p877_p4, %p1081_p7  ;;  %p883_p10 = por %p882_p9, %p881_p8 }
  0x3d   : > { %345 = vperm.xlu0 %857, %v323_v7   ;;  %738 = vmatmul.msk.f32.gmra.mxu0 %vm353_vm2, %v322_v8 }
  0x3e   : > { %p879_p6 = pneg %p878_p5 }
  0x3f   : > { %421 = vperm.xlu1 %858, %v339_v14   ;;  %411 = vperm.xlu2 %859, %v337_v26  }
  0x40   : > { %p884_p11 = pnand %p883_p10, %p879_p6 }
  0x45   : > { %406 = vperm.xlu0 %857, %v336_v9  }
  0x47   : > { %401 = vperm.xlu1 %858, %v335_v18   ;;  %396 = vperm.xlu2 %859, %v334_v28  }
  0x4d   : > { %391 = vperm.xlu0 %857, %v333_v10  }
  0x91   : > { %v417_v49 = vpop.permute.xlu2 %416 }
  0x99   : > { %v412_v54 = vpop.permute.xlu2 %411 }
  0xa1   : > { %v397_v60 = vpop.permute.xlu2 %396 }
  0xa7   : > { %v351_v12 = vpop.permute.xlu0 %350 }
  0xa9   : > { %v1208_v36 = vpop.permute.xlu1 %426 }
  0xaf   : > { %v346_v15 = vpop.permute.xlu0 %345 }
  0xb1   : > { %v422_v50 = vpop.permute.xlu1 %421 }
  0xb2   : > { %v381_v13 = vpop.f32.mrf.mxu0 }
  0xb3   : > { %v382_v19 = vadd.f32 %v381_v13, %v346_v15 }
  0xb5   : > { %v387_v22 = vmax.f32 %v382_v19, 0.0 }
  0xb7   : > { %v407_v56 = vpop.permute.xlu0 %406 }
  0xb9   : > { %v402_v58 = vpop.permute.xlu1 %401 }
  0xba   : > { %v384_v16 = vpop.f32.mrf.mxu0 }
  0xbb   : > { %v385_v20 = vadd.f32 %v384_v16, %v351_v12 }
  0xbd   : > { %v388_v21 = vmax.f32 %v385_v20, 0.0 }
  0xbf   : > { %468 = vmatpush.msra.mxu1 %v388_v21  ;;  %764 = vmatpush.msra.mxu3 %v388_v21  ;;  %v392_v62 = vpop.permute.xlu0 %391 }
  0xc1   : > { %469 = vmatpush.msra.mxu1 %v387_v22  ;;  %765 = vmatpush.msra.mxu3 %v387_v22 }
  0xc2   : > { %739 = vmatmul.msk.f32.vlgmr.msra.gmra.mxu1 %vm429_vm3, %v325_v23  ;;  %746 = vmatmul.msk.f32.vlgmr.msra.gmra.mxu3 %vm429_vm3, %v1165_v24 }
  0xc3   : > { %748 = vmatpush.msk.msrb.mxu3 %vm360_vm1, %v1169_v25 }
  0xca   : > { %740 = vmatmul.msk.f32.gmra.mxu1 %vm429_vm3, %v326_v27  ;;  %749 = vmatmul.msk.f32.vlgmr.msrb.gmra.mxu3 %vm353_vm2, %v321_v5 }
  0xd2   : > { %741 = vmatmul.msk.f32.gmra.mxu1 %vm429_vm3, %v327_v29  ;;  %750 = vmatmul.msk.f32.gmra.mxu3 %vm353_vm2, %v322_v8 }
  0xda   : > { %742 = vmatmul.msk.f32.gmra.mxu1 %vm429_vm3, %v328_v30 }
  0xe2   : > { %743 = vmatmul.msk.f32.gmra.mxu1 %vm429_vm3, %v329_v31 }
  0xea   : > { %744 = vmatmul.msk.f32.gmra.mxu1 %vm429_vm3, %v330_v32 }
  0xf2   : > { %745 = vmatmul.msk.f32.gmra.mxu1 %vm429_vm3, %v331_v33 }
 0x13f   : > { %v471_v34 = vpop.f32.mrf.mxu1 }
 0x140   : > { %v472_v63 = vadd.f32 %v471_v34, %v392_v62 }
 0x145   : > { %v492_v35 = vpop.f32.mrf.mxu3 }
 0x146   : > { %v493_v38 = vadd.f32 %v492_v35, %v1208_v36 }
 0x147   : > { %v474_v37 = vpop.f32.mrf.mxu1 }
 0x148   : > { %503 = vmatpush.xpose.msra.mxu2 %v493_v38  ;;  %v475_v61 = vadd.f32 %v474_v37, %v397_v60  ;;  %v627_v37 = vld [vmem:[%s1117_s12 + $0x1] sm:$0x1] }
 0x14d   : > { %v550_v39 = vpop.f32.mrf.mxu3 }
 0x14e   : > { %v551_v42 = vadd.f32 %v550_v39, %v346_v15 }
 0x14f   : > { %v477_v40 = vpop.f32.mrf.mxu1 }
 0x150   : > { %v556_v46 = vmax.f32 %v551_v42, 0.0  ;;  %v478_v59 = vadd.f32 %v477_v40, %v402_v58 }
 0x155   : > { %v553_v41 = vpop.f32.mrf.mxu3 }
 0x156   : > { %v554_v43 = vadd.f32 %v553_v41, %v351_v12  ;;  %v524_v12 = vld [vmem:[%s1117_s12] sm:$0x1] }
 0x157   : > { %v480_v44 = vpop.f32.mrf.mxu1 }
 0x158   : > { %v557_v45 = vmax.f32 %v554_v43, 0.0  ;;  %v481_v57 = vadd.f32 %v480_v44, %v407_v56 }
 0x15a   : > { %572 = vmatpush.msrb.mxu0 %v557_v45 }
 0x15c   : > { %573 = vmatpush.msrb.mxu0 %v556_v46 }
 0x15d   : > { %751 = vmatmul.msk.f32.vlgmr.msrb.gmra.mxu0 %vm429_vm3, %v325_v23 }
 0x15f   : > { %v483_v47 = vpop.f32.mrf.mxu1 }
 0x160   : > { %v484_v55 = vadd.f32 %v483_v47, %v412_v54 }
 0x165   : > { %752 = vmatmul.msk.f32.gmra.mxu0 %vm429_vm3, %v326_v27 }
 0x167   : > { %v486_v48 = vpop.f32.mrf.mxu1 }
 0x168   : > { %v487_v53 = vadd.f32 %v486_v48, %v417_v49 }
 0x16d   : > { %753 = vmatmul.msk.f32.gmra.mxu0 %vm429_vm3, %v327_v29 }
 0x16f   : > { %v489_v51 = vpop.f32.mrf.mxu1 }
 0x170   : > { %v490_v52 = vadd.f32 %v489_v51, %v422_v50 }
 0x172   : > { %504 = vmatpush.xpose.msra.mxu2 %v490_v52 }
 0x175   : > { %754 = vmatmul.msk.f32.gmra.mxu0 %vm429_vm3, %v328_v30 }
 0x176   : > { %505 = vmatpush.xpose.msra.mxu2 %v487_v53 }
 0x17a   : > { %506 = vmatpush.xpose.msra.mxu2 %v484_v55 }
 0x17d   : > { %755 = vmatmul.msk.f32.gmra.mxu0 %vm429_vm3, %v329_v31 }
 0x17e   : > { %507 = vmatpush.xpose.msra.mxu2 %v481_v57 }
 0x182   : > { %508 = vmatpush.xpose.msra.mxu2 %v478_v59 }
 0x186   : > { %509 = vmatpush.xpose.msra.mxu2 %v475_v61 }
 0x18a   : > { %510 = vmatpush.xpose.msra.mxu2 %v472_v63 }
 0x18d   : > { %511 = vmatmul.f32.vlgmr.msra.gmra.mxu2 %v1123_v3 }
 0x18e   : > { %766 = vmatpush.msrb.mxu2 %v557_v45 }
 0x190   : > { %767 = vmatpush.msrb.mxu2 %v556_v46 }
 0x195   : > { %756 = vmatmul.msk.f32.vlgmr.msrb.gmra.mxu2 %vm429_vm3, %v330_v32 }
 0x19d   : > { %757 = vmatmul.msk.f32.gmra.mxu2 %vm429_vm3, %v331_v33 }
 0x1a5   : > { %758 = vmatmul.msk.f32.gmra.mxu2 %vm429_vm3, %v1165_v24 }
 0x1da   : > { %v575_v0 = vpop.f32.mrf.mxu0 }
 0x1db   : > { %v576_v28 = vadd.f32 %v575_v0, %v392_v62 }
 0x1e2   : > { %v578_v5 = vpop.f32.mrf.mxu0 }
 0x1e3   : > { %v579_v27 = vadd.f32 %v578_v5, %v397_v60 }
 0x1ea   : > { %v581_v13 = vpop.f32.mrf.mxu0 }
 0x1eb   : > { %v582_v26 = vadd.f32 %v581_v13, %v402_v58 }
 0x1f2   : > { %v584_v17 = vpop.f32.mrf.mxu0 }
 0x1f3   : > { %v585_v24 = vadd.f32 %v584_v17, %v407_v56 }
 0x1fa   : > { %v587_v22 = vpop.f32.mrf.mxu0 }
 0x1fb   : > { %v588_v23 = vadd.f32 %v587_v22, %v412_v54 }
 0x210   : > { %v512_v2 = vpop.f32.mrf.mxu2 }
 0x211   : > { %v515_v4 = vmul.f32 %v512_v2, %v341_v1 }
 0x213   : > { %v517_v3 = vsel %vm516_vm4, %v515_v4, 0.0 }
 0x214   : > { %v518_v6 = vrot.slane %v517_v3, 4 }
 0x216   : > { %v519_v7 = vadd.f32 %v518_v6, %v517_v3 }
 0x218   : > { %v520_v8 = vrot.slane %v519_v7, 2  ;;  %v590_v9 = vpop.f32.mrf.mxu2 }
 0x219   : > { %v591_v21 = vadd.f32 %v590_v9, %v417_v49 }
 0x21a   : > { %v521_v10 = vadd.f32 %v520_v8, %v519_v7 }
 0x21c   : > { %v522_v11 = vrot.slane %v521_v10, 1 }
 0x21e   : > { %v523_v14 = vadd.f32 %v522_v11, %v521_v10 }
 0x220   : > { %v593_v15 = vpop.f32.mrf.mxu2  ;;  %v525_v16 = vadd.f32 %v524_v12, %v523_v14 }
 0x221   : > { %v594_v20 = vadd.f32 %v593_v15, %v422_v50 }
 0x222   : > { %527 = vst.msk [vmem:[%s1117_s12] sm:$0x1] %vm526_vm5, %v525_v16 }
 0x228   : > { %v596_v18 = vpop.f32.mrf.mxu2 }
 0x229   : > { %v597_v19 = vadd.f32 %v596_v18, %v1208_v36 }
 0x22b   : > { %607 = vmatpush.xpose.msra.mxu3 %v597_v19 }
 0x22f   : > { %608 = vmatpush.xpose.msra.mxu3 %v594_v20 }
 0x233   : > { %609 = vmatpush.xpose.msra.mxu3 %v591_v21 }
 0x237   : > { %610 = vmatpush.xpose.msra.mxu3 %v588_v23 }
 0x23b   : > { %611 = vmatpush.xpose.msra.mxu3 %v585_v24 }
 0x23f   : > { %612 = vmatpush.xpose.msra.mxu3 %v582_v26 }
 0x243   : > { %613 = vmatpush.xpose.msra.mxu3 %v579_v27 }
 0x247   : > { %614 = vmatpush.xpose.msra.mxu3 %v576_v28 }
 0x24a   : > { %615 = vmatmul.f32.vlgmr.msra.gmra.mxu3 %v1169_v25 }
 0x2cd   : > { %v616_v29 = vpop.f32.mrf.mxu3 }
 0x2ce   : > { %v619_v30 = vmul.f32 %v616_v29, %v341_v1 }
 0x2d0   : > { %v620_v31 = vsel %vm516_vm4, %v619_v30, 0.0 }
 0x2d1   : > { %v621_v32 = vrot.slane %v620_v31, 4 }
 0x2d3   : > { %v622_v33 = vadd.f32 %v621_v32, %v620_v31 }
 0x2d5   : > { %v623_v34 = vrot.slane %v622_v33, 2 }
 0x2d7   : > { %v624_v35 = vadd.f32 %v623_v34, %v622_v33 }
 0x2d9   : > { %v625_v36 = vrot.slane %v624_v35, 1 }
 0x2db   : > { %v626_v25 = vadd.f32 %v625_v36, %v624_v35 }
 0x2dd   : > { %v628_v38 = vadd.f32 %v627_v37, %v626_v25 }
 0x2df   : > { %629 = vst.msk [vmem:[%s1117_s12 + $0x1] sm:$0x1] %vm526_vm5, %v628_v38 }
 0x2e0   : > { %887 = shalt.err (!%p884_p11)
}
 0x2e1   : > { %768 = dma.vmem_to_hbm [thread:$0]  (%p1081_p7), %s644_s13, 32, %s646_s10, %s631_s16  }
 0x2e2 PF: > { %p774_p13 = scmp.ge.s32.totalorder %s970_s30, 2  ;;  %s657_s12 = sand.u32 1, %s934_s21  }
 0x2e3   : > { %s658_s11 = scalar_lea.sflag [#allocation4], %s657_s12 }
 0x2e4   : > { %p771_p0 = pnand %p774_p13, %p1089_p12 }
 0x2e6   : > { %p772_p1 = pneg %p771_p0 }
 0x2e8   : > { %929 = dma.done.wait (%p772_p1), %s658_s11, 32  }
 0x2e9   : > { %931 = vsyncadd (%p772_p1), %s658_s11, 4294967264  ;;  %s19_s30 = sadd.s32 1, %s970_s30   ;;  %s1301_s15 = sld [smem:[#allocation6_spill]] }
 0x2ea   : > { %p16_p2 = scmp.ge.s32.totalorder %s19_s30, 10   ;;  %s1302_s13 = sld [smem:[#allocation7_spill]] }
 0x2eb   : > { %s1303_s21 = smov %s938_s22  ;;  %s1304_s22 = smov %s942_s23 }
 0x2ec   : > { %s1305_s23 = smov %s1094_s19  ;;  %s1306_s24 = smov %s950_s25 }
 0x2ed   : > { %s1307_s25 = smov %s1097_s20  ;;  %s1308_s26 = smov %s962_s28 }
 0x2ee   : > { %s1309_s27 = smov %s966_s29  ;;  %18 = sbr.rel (!%p16_p2) target bundleno = 6 (0x6), region = 130 }
 0x2ef   : > { %s1310_s28 = smov %s1301_s15 }
 0x2f0   : > { %s1311_s29 = smov %s1302_s13 }
 0x2f3   :  { %664 = vsyncpa [#allocation4], 1 }
 0x2f4   :  { %666 = vsyncpa [#allocation4 + $0x1], 1 }

// kernel: tpu_custom_call.1
= control target key start
LH: loop header
LB: loop body
LE: loop exit
PB: predicated region body
PF: predicated region fallthrough
CT: control target
= control target key end

     0   :  { %11 = vsyncpa [#allocation4], 0  ;;  %s1285_s0 = inlined_call_operand.vmem [shape: f32[8,4,256], index: 0, kind: input, shape index: {}]   ;;  %s1286_s1 = inlined_call_operand.vmem [shape: f32[16,4], index: 1, kind: input, shape index: {}]   ;;  %s1287_s2 = inlined_call_operand.vmem [shape: f32[16,1], index: 2, kind: input, shape index: {}]   ;;  %s1288_s3 = inlined_call_operand.vmem [shape: f32[64,16], index: 3, kind: input, shape index: {}]   ;;  %s1289_s4 = inlined_call_operand.vmem [shape: f32[64,1], index: 4, kind: input, shape index: {}]   ;;  %s1290_s5 = inlined_call_operand.vmem [shape: f32[4,64], index: 5, kind: input, shape index: {}]   ;;  %s1291_s6 = inlined_call_operand.hbm [shape: f32[4,2,64], index: 6, kind: output, shape index: {}]  }
   0x1   :  { %13 = vsyncpa [#allocation4 + $0x1], 0  ;;  %s1009_s21 = smov 0   ;;  %s1011_s22 = smov 0  }
   0x2   :  { %s1013_s23 = smov 0   ;;  %s1015_s24 = smov 0  }
   0x3   :  { %s1017_s25 = smov 0   ;;  %s1019_s26 = smov 0  }
   0x4   :  { %s1021_s27 = smov 0   ;;  %s1023_s28 = smov 0  }
   0x5   :  { %s1025_s29 = smov 0   ;;  %s1027_s30 = smov 0  }
   0x6 LB: > { %s724_s7 = sadd.s32 4294967295, %s970_s30   ;;  %s725_s8 = sadd.s32 4294967294, %s970_s30   ;;  %s970_s30 = sphi %s1027_s30, %s19_s30   ;;  %s966_s29 = sphi %s1025_s29, %s1311_s29   ;;  %s962_s28 = sphi %s1023_s28, %s1310_s28   ;;  %s958_s27 = sphi %s1021_s27, %s1309_s27   ;;  %s954_s26 = sphi %s1019_s26, %s1308_s26   ;;  %s950_s25 = sphi %s1017_s25, %s1307_s25   ;;  %s946_s24 = sphi %s1015_s24, %s1306_s24   ;;  %s942_s23 = sphi %s1013_s23, %s1305_s23   ;;  %s938_s22 = sphi %s1011_s22, %s1304_s22   ;;  %s934_s21 = sphi %s1009_s21, %s1303_s21  }
   0x7   : > { %s28_s9 = sadd.s32 1, %s962_s28  ;;  %s31_s10 = sadd.s32 1, %s966_s29 }
   0x8   : > { %p29_p0 = scmp.ge.s32.totalorder %s28_s9, 2  ;;  %s40_s11 = sadd.s32 1, %s950_s25 }
   0x9   : > { %p47_p1 = scmp.ne.s32.totalorder %s950_s25, %s946_s24  ;;  %p48_p2 = scmp.eq.s32.totalorder %s970_s30, 0 }
   0xa   : > { %s1313_s9 = smov (%p29_p0, %s28_s9), 0  ;;  %s1315_s10 = smov (!%p29_p0, %s31_s10), %s966_s29 }
   0xb   : > { %1295 = sst [smem:[#allocation6_spill]] %s1313_s9  ;;  %s36_s12 = ssub.s32 %s962_s28, %s1313_s9 }
   0xc   : > { %p1072_p3 = por %p48_p2, %p47_p1  ;;  %p33_p4 = scmp.ge.s32.totalorder %s1315_s10, 4 }
   0xd   : > { %s171_s14 = sadd.s32 1, %s942_s23  ;;  %p181_p5 = scmp.ne.s32.totalorder %s942_s23, %s938_s22 }
   0xe   : > { %p182_p6 = scmp.eq.s32.totalorder %s724_s7, 7  ;;  %s1317_s10 = smov (%p33_p4, %s1315_s10), 0 }
   0xf   : > { %1297 = sst [smem:[#allocation7_spill]] %s1317_s10  ;;  %p187_p8 = scmp.ne.s32.totalorder %s938_s22, %s934_s21 }
  0x10   : > { %p1081_p7 = por %p182_p6, %p181_p5  ;;  %s35_s16 = ssub.s32 %s966_s29, %s1317_s10 }
  0x11   : > { %p188_p9 = scmp.eq.s32.totalorder %s725_s8, 7  ;;  %s37_s17 = sor.u32 %s36_s12, %s35_s16 }
  0x12   : > { %p169_p10 = scmp.eq.s32.totalorder %s35_s16, 0  ;;  %p38_p11 = scmp.eq.s32.totalorder %s37_s17, 0 }
  0x13   : > { %p1089_p12 = por %p188_p9, %p187_p8  ;;  %p727_p13 = scmp.ge.s32.totalorder %s970_s30, 8 }
  0x14   : > { %s1094_s19 = scalar_select %p169_p10, %s942_s23, %s171_s14  }
  0x15   : > { %s1097_s20 = scalar_select %p38_p11, %s950_s25, %s40_s11  }
  0x16   : > { %219 = sbr.rel (%p727_p13) target bundleno = 35 (0x23), region = 36 }
  0x1b   : > { %222 = sbr.rel (!%p1072_p3) target bundleno = 35 (0x23), region = 40  ;;  %s224_s7 = sand.u32 (%p1072_p3), 1, %s950_s25  }
  0x1c   : > { %s763_s8 = sshll.u32 (%p1072_p3), %s966_s29, 2  ;;  %s728_s12 = sshll.u32 (%p1072_p3), %s224_s7, 3 }
  0x1d   : > { %s229_s16 = sadd.s32 (%p1072_p3), %s962_s28, %s763_s8  ;;  %s226_s11 = scalar_lea.vmem (%p1072_p3), [#allocation2], %s728_s12 }
  0x1e   : > { %s731_s17 = sshll.u32 (%p1072_p3), %s229_s16, 2 }
  0x1f   : > { %s231_s14 = scalar_lea.vmem (%p1072_p3), %s1285_s0, %s731_s17 }
  0x20   : > { %v248_v0 = vld [vmem:[%s231_s14] sm:$0xf]  ;;  %v250_v1 = vld [vmem:[%s231_s14 + $0x8] sm:$0xf] }
  0x21   : > { %249 = vst [vmem:[%s226_s11] sm:$0xf] %v248_v0 }
  0x22   : > { %251 = vst [vmem:[%s226_s11 + $0x4] sm:$0xf] %v250_v1 }
  0x23 PF: > { %p732_p0 = scmp.ge.s32.totalorder %s970_s30, 1  ;;  %p278_p1 = scmp.lt.s32.totalorder %s970_s30, 9 }
  0x25   : > { %p279_p2 = pnand %p732_p0, %p278_p1 }
  0x26   : > { %s285_s13 = sand.u32 (!%p279_p2), 1, %s946_s24   ;;  %s1294_s7 = sand.u32 (!%p279_p2), 1, %s938_s22  }
  0x27   : > { %282 = sbr.rel (%p279_p2) target bundleno = 738 (0x2e2), region = 81  ;;  %s1112_s9 = sshll.u32 (!%p279_p2), %s285_s13, 3 }
  0x28   : > { %s734_s10 = sshll.u32 (!%p279_p2), %s1294_s7, 1  ;;  %s287_s8 = scalar_lea.vmem (!%p279_p2), [#allocation2], %s1112_s9 }
  0x29   : > { %s1117_s12 = scalar_lea.vmem (!%p279_p2), [#allocation3], %s734_s10  ;;  %p735_p3 = scmp.ne.s32.totalorder (!%p279_p2), %s954_s26, 0 }
  0x2c   : > { %318 = sbr.rel (%p735_p3) target bundleno = 51 (0x33), region = 89 }
  0x31   : > { %vm319_vm0 = vcmask 517120   ;;  %v972_v2 = vmov 0.0  }
  0x32   : > { %320 = vst.msk [vmem:[%s1117_s12] sm:$0x3] %vm319_vm0, %v972_v2 }
  0x33 PF: > { %v1123_v3 = vld [vmem:[%s287_s8] sm:$0xf]  ;;  %vm360_vm1 = vcmask 1043456   ;;  %v973_v6 = vmov 0   ;;  %vm353_vm2 = vcmask 31744   ;;  %v336_v9 = vld [vmem:[%s1289_s4 + $0x18] sm:$0xff] }
  0x34   : > { %v324_v4 = vld [vmem:[%s1287_s2 + $0x8] sm:$0xff]  ;;  %v321_v5 = vld [vmem:[%s1286_s1] sm:$0xff]  ;;  %857 = vset.pattern.permute.xlu0 %v973_v6  ;;  %736 = vmatpush.msk.msra.mxu0 %vm360_vm1, %v1123_v3  ;;  %v340_v11 = vld [vmem:[%s1289_s4 + $0x38] sm:$0xff]  ;;  %vm429_vm3 = vcmask 130048   ;;  %vm516_vm4 = vcmask 519168   ;;  %vm526_vm5 = vcmask 516096  }
  0x35   : > { %350 = vperm.xlu0 %857, %v324_v4   ;;  %737 = vmatmul.msk.f32.vlgmr.msra.gmra.mxu0 %vm353_vm2, %v321_v5  ;;  %v323_v7 = vld [vmem:[%s1287_s2] sm:$0xff]  ;;  %v322_v8 = vld [vmem:[%s1286_s1 + $0x8] sm:$0xff]  ;;  %v339_v14 = vld [vmem:[%s1289_s4 + $0x30] sm:$0xff]  ;;  %s760_s7 = sshll.u32 %s958_s27, 1  ;;  %s643_s13 = sshll.u32 %s1117_s12, 4  ;;  %s644_s13 = int_to_ptr.vmem [resolvable:$true] %s643_s13 }
  0x36   : > { %858 = vset.pattern.permute.xlu1 %v973_v6  ;;  %859 = vset.pattern.permute.xlu2 %v973_v6  ;;  %v333_v10 = vld [vmem:[%s1289_s4] sm:$0xff]  ;;  %v338_v17 = vld [vmem:[%s1289_s4 + $0x28] sm:$0xff]  ;;  %v335_v18 = vld [vmem:[%s1289_s4 + $0x10] sm:$0xff]  ;;  %s641_s11 = scalar_lea.hbm %s1291_s6, %s760_s7  ;;  %s1300_s24 = sand.u32 1, %s938_s22  }
  0x37   : > { %426 = vperm.xlu1 %858, %v340_v11   ;;  %416 = vperm.xlu2 %859, %v338_v17   ;;  %v325_v23 = vld [vmem:[%s1288_s3] sm:$0xff]  ;;  %v1165_v24 = vld [vmem:[%s1288_s3 + $0x38] sm:$0xff]  ;;  %v326_v27 = vld [vmem:[%s1288_s3 + $0x8] sm:$0xff]  ;;  %s645_s10 = sshll.u32 %s641_s11, 4  ;;  %s631_s16 = scalar_lea.sflag [#allocation4], %s1300_s24  ;;  %s646_s10 = int_to_ptr.hbm [resolvable:$true] %s645_s10 }
  0x38   : > { %v1169_v25 = vld [vmem:[%s287_s8 + $0x4] sm:$0xf]  ;;  %v327_v29 = vld [vmem:[%s1288_s3 + $0x10] sm:$0xff]  ;;  %v328_v30 = vld [vmem:[%s1288_s3 + $0x18] sm:$0xff]  ;;  %s874_s27 = sshra.s32 %s646_s10, 4  ;;  %s880_s7 = scalar_lea.hbm %s1291_s6, 8  ;;  %s875_s27 = int_to_ptr.hbm [resolvable:$true] %s874_s27 }
  0x39   : > { %v337_v26 = vld [vmem:[%s1289_s4 + $0x20] sm:$0xff]  ;;  %v334_v28 = vld [vmem:[%s1289_s4 + $0x8] sm:$0xff]  ;;  %v331_v33 = vld [vmem:[%s1288_s3 + $0x30] sm:$0xff]  ;;  %s876_s9 = scalar_lea.hbm %s875_s27, 2  ;;  %p881_p8 = scmp.lt.s32.totalorder %s875_s27, %s1291_s6 }
  0x3a   : > { %v329_v31 = vld [vmem:[%s1288_s3 + $0x20] sm:$0xff]  ;;  %v330_v32 = vld [vmem:[%s1288_s3 + $0x28] sm:$0xff]  ;;  %p877_p4 = scmp.ne.s32.totalorder %s875_s27, %s876_s9  ;;  %p882_p9 = scmp.lt.s32.totalorder %s880_s7, %s876_s9 }
  0x3b   : > { %v341_v1 = vld [vmem:[%s1290_s5] sm:$0xf] }
  0x3c   : > { %p878_p5 = pnand %p877_p4, %p1081_p7  ;;  %p883_p10 = por %p882_p9, %p881_p8 }
  0x3d   : > { %345 = vperm.xlu0 %857, %v323_v7   ;;  %738 = vmatmul.msk.f32.gmra.mxu0 %vm353_vm2, %v322_v8 }
  0x3e   : > { %p879_p6 = pneg %p878_p5 }
  0x3f   : > { %421 = vperm.xlu1 %858, %v339_v14   ;;  %411 = vperm.xlu2 %859, %v337_v26  }
  0x40   : > { %p884_p11 = pnand %p883_p10, %p879_p6 }
  0x45   : > { %406 = vperm.xlu0 %857, %v336_v9  }
  0x47   : > { %401 = vperm.xlu1 %858, %v335_v18   ;;  %396 = vperm.xlu2 %859, %v334_v28  }
  0x4d   : > { %391 = vperm.xlu0 %857, %v333_v10  }
  0x91   : > { %v417_v49 = vpop.permute.xlu2 %416 }
  0x99   : > { %v412_v54 = vpop.permute.xlu2 %411 }
  0xa1   : > { %v397_v60 = vpop.permute.xlu2 %396 }
  0xa7   : > { %v351_v12 = vpop.permute.xlu0 %350 }
  0xa9   : > { %v1208_v36 = vpop.permute.xlu1 %426 }
  0xaf   : > { %v346_v15 = vpop.permute.xlu0 %345 }
  0xb1   : > { %v422_v50 = vpop.permute.xlu1 %421 }
  0xb2   : > { %v381_v13 = vpop.f32.mrf.mxu0 }
  0xb3   : > { %v382_v19 = vadd.f32 %v381_v13, %v346_v15 }
  0xb5   : > { %v387_v22 = vmax.f32 %v382_v19, 0.0 }
  0xb7   : > { %v407_v56 = vpop.permute.xlu0 %406 }
  0xb9   : > { %v402_v58 = vpop.permute.xlu1 %401 }
  0xba   : > { %v384_v16 = vpop.f32.mrf.mxu0 }
  0xbb   : > { %v385_v20 = vadd.f32 %v384_v16, %v351_v12 }
  0xbd   : > { %v388_v21 = vmax.f32 %v385_v20, 0.0 }
  0xbf   : > { %468 = vmatpush.msra.mxu1 %v388_v21  ;;  %764 = vmatpush.msra.mxu3 %v388_v21  ;;  %v392_v62 = vpop.permute.xlu0 %391 }
  0xc1   : > { %469 = vmatpush.msra.mxu1 %v387_v22  ;;  %765 = vmatpush.msra.mxu3 %v387_v22 }
  0xc2   : > { %739 = vmatmul.msk.f32.vlgmr.msra.gmra.mxu1 %vm429_vm3, %v325_v23  ;;  %746 = vmatmul.msk.f32.vlgmr.msra.gmra.mxu3 %vm429_vm3, %v1165_v24 }
  0xc3   : > { %748 = vmatpush.msk.msrb.mxu3 %vm360_vm1, %v1169_v25 }
  0xca   : > { %740 = vmatmul.msk.f32.gmra.mxu1 %vm429_vm3, %v326_v27  ;;  %749 = vmatmul.msk.f32.vlgmr.msrb.gmra.mxu3 %vm353_vm2, %v321_v5 }
  0xd2   : > { %741 = vmatmul.msk.f32.gmra.mxu1 %vm429_vm3, %v327_v29  ;;  %750 = vmatmul.msk.f32.gmra.mxu3 %vm353_vm2, %v322_v8 }
  0xda   : > { %742 = vmatmul.msk.f32.gmra.mxu1 %vm429_vm3, %v328_v30 }
  0xe2   : > { %743 = vmatmul.msk.f32.gmra.mxu1 %vm429_vm3, %v329_v31 }
  0xea   : > { %744 = vmatmul.msk.f32.gmra.mxu1 %vm429_vm3, %v330_v32 }
  0xf2   : > { %745 = vmatmul.msk.f32.gmra.mxu1 %vm429_vm3, %v331_v33 }
 0x13f   : > { %v471_v34 = vpop.f32.mrf.mxu1 }
 0x140   : > { %v472_v63 = vadd.f32 %v471_v34, %v392_v62 }
 0x145   : > { %v492_v35 = vpop.f32.mrf.mxu3 }
 0x146   : > { %v493_v38 = vadd.f32 %v492_v35, %v1208_v36 }
 0x147   : > { %v474_v37 = vpop.f32.mrf.mxu1 }
 0x148   : > { %503 = vmatpush.xpose.msra.mxu2 %v493_v38  ;;  %v475_v61 = vadd.f32 %v474_v37, %v397_v60  ;;  %v627_v37 = vld [vmem:[%s1117_s12 + $0x1] sm:$0x1] }
 0x14d   : > { %v550_v39 = vpop.f32.mrf.mxu3 }
 0x14e   : > { %v551_v42 = vadd.f32 %v550_v39, %v346_v15 }
 0x14f   : > { %v477_v40 = vpop.f32.mrf.mxu1 }
 0x150   : > { %v556_v46 = vmax.f32 %v551_v42, 0.0  ;;  %v478_v59 = vadd.f32 %v477_v40, %v402_v58 }
 0x155   : > { %v553_v41 = vpop.f32.mrf.mxu3 }
 0x156   : > { %v554_v43 = vadd.f32 %v553_v41, %v351_v12  ;;  %v524_v12 = vld [vmem:[%s1117_s12] sm:$0x1] }
 0x157   : > { %v480_v44 = vpop.f32.mrf.mxu1 }
 0x158   : > { %v557_v45 = vmax.f32 %v554_v43, 0.0  ;;  %v481_v57 = vadd.f32 %v480_v44, %v407_v56 }
 0x15a   : > { %572 = vmatpush.msrb.mxu0 %v557_v45 }
 0x15c   : > { %573 = vmatpush.msrb.mxu0 %v556_v46 }
 0x15d   : > { %751 = vmatmul.msk.f32.vlgmr.msrb.gmra.mxu0 %vm429_vm3, %v325_v23 }
 0x15f   : > { %v483_v47 = vpop.f32.mrf.mxu1 }
 0x160   : > { %v484_v55 = vadd.f32 %v483_v47, %v412_v54 }
 0x165   : > { %752 = vmatmul.msk.f32.gmra.mxu0 %vm429_vm3, %v326_v27 }
 0x167   : > { %v486_v48 = vpop.f32.mrf.mxu1 }
 0x168   : > { %v487_v53 = vadd.f32 %v486_v48, %v417_v49 }
 0x16d   : > { %753 = vmatmul.msk.f32.gmra.mxu0 %vm429_vm3, %v327_v29 }
 0x16f   : > { %v489_v51 = vpop.f32.mrf.mxu1 }
 0x170   : > { %v490_v52 = vadd.f32 %v489_v51, %v422_v50 }
 0x172   : > { %504 = vmatpush.xpose.msra.mxu2 %v490_v52 }
 0x175   : > { %754 = vmatmul.msk.f32.gmra.mxu0 %vm429_vm3, %v328_v30 }
 0x176   : > { %505 = vmatpush.xpose.msra.mxu2 %v487_v53 }
 0x17a   : > { %506 = vmatpush.xpose.msra.mxu2 %v484_v55 }
 0x17d   : > { %755 = vmatmul.msk.f32.gmra.mxu0 %vm429_vm3, %v329_v31 }
 0x17e   : > { %507 = vmatpush.xpose.msra.mxu2 %v481_v57 }
 0x182   : > { %508 = vmatpush.xpose.msra.mxu2 %v478_v59 }
 0x186   : > { %509 = vmatpush.xpose.msra.mxu2 %v475_v61 }
 0x18a   : > { %510 = vmatpush.xpose.msra.mxu2 %v472_v63 }
 0x18d   : > { %511 = vmatmul.f32.vlgmr.msra.gmra.mxu2 %v1123_v3 }
 0x18e   : > { %766 = vmatpush.msrb.mxu2 %v557_v45 }
 0x190   : > { %767 = vmatpush.msrb.mxu2 %v556_v46 }
 0x195   : > { %756 = vmatmul.msk.f32.vlgmr.msrb.gmra.mxu2 %vm429_vm3, %v330_v32 }
 0x19d   : > { %757 = vmatmul.msk.f32.gmra.mxu2 %vm429_vm3, %v331_v33 }
 0x1a5   : > { %758 = vmatmul.msk.f32.gmra.mxu2 %vm429_vm3, %v1165_v24 }
 0x1da   : > { %v575_v0 = vpop.f32.mrf.mxu0 }
 0x1db   : > { %v576_v28 = vadd.f32 %v575_v0, %v392_v62 }
 0x1e2   : > { %v578_v5 = vpop.f32.mrf.mxu0 }
 0x1e3   : > { %v579_v27 = vadd.f32 %v578_v5, %v397_v60 }
 0x1ea   : > { %v581_v13 = vpop.f32.mrf.mxu0 }
 0x1eb   : > { %v582_v26 = vadd.f32 %v581_v13, %v402_v58 }
 0x1f2   : > { %v584_v17 = vpop.f32.mrf.mxu0 }
 0x1f3   : > { %v585_v24 = vadd.f32 %v584_v17, %v407_v56 }
 0x1fa   : > { %v587_v22 = vpop.f32.mrf.mxu0 }
 0x1fb   : > { %v588_v23 = vadd.f32 %v587_v22, %v412_v54 }
 0x210   : > { %v512_v2 = vpop.f32.mrf.mxu2 }
 0x211   : > { %v515_v4 = vmul.f32 %v512_v2, %v341_v1 }
 0x213   : > { %v517_v3 = vsel %vm516_vm4, %v515_v4, 0.0 }
 0x214   : > { %v518_v6 = vrot.slane %v517_v3, 4 }
 0x216   : > { %v519_v7 = vadd.f32 %v518_v6, %v517_v3 }
 0x218   : > { %v520_v8 = vrot.slane %v519_v7, 2  ;;  %v590_v9 = vpop.f32.mrf.mxu2 }
 0x219   : > { %v591_v21 = vadd.f32 %v590_v9, %v417_v49 }
 0x21a   : > { %v521_v10 = vadd.f32 %v520_v8, %v519_v7 }
 0x21c   : > { %v522_v11 = vrot.slane %v521_v10, 1 }
 0x21e   : > { %v523_v14 = vadd.f32 %v522_v11, %v521_v10 }
 0x220   : > { %v593_v15 = vpop.f32.mrf.mxu2  ;;  %v525_v16 = vadd.f32 %v524_v12, %v523_v14 }
 0x221   : > { %v594_v20 = vadd.f32 %v593_v15, %v422_v50 }
 0x222   : > { %527 = vst.msk [vmem:[%s1117_s12] sm:$0x1] %vm526_vm5, %v525_v16 }
 0x228   : > { %v596_v18 = vpop.f32.mrf.mxu2 }
 0x229   : > { %v597_v19 = vadd.f32 %v596_v18, %v1208_v36 }
 0x22b   : > { %607 = vmatpush.xpose.msra.mxu3 %v597_v19 }
 0x22f   : > { %608 = vmatpush.xpose.msra.mxu3 %v594_v20 }
 0x233   : > { %609 = vmatpush.xpose.msra.mxu3 %v591_v21 }
 0x237   : > { %610 = vmatpush.xpose.msra.mxu3 %v588_v23 }
 0x23b   : > { %611 = vmatpush.xpose.msra.mxu3 %v585_v24 }
 0x23f   : > { %612 = vmatpush.xpose.msra.mxu3 %v582_v26 }
 0x243   : > { %613 = vmatpush.xpose.msra.mxu3 %v579_v27 }
 0x247   : > { %614 = vmatpush.xpose.msra.mxu3 %v576_v28 }
 0x24a   : > { %615 = vmatmul.f32.vlgmr.msra.gmra.mxu3 %v1169_v25 }
 0x2cd   : > { %v616_v29 = vpop.f32.mrf.mxu3 }
 0x2ce   : > { %v619_v30 = vmul.f32 %v616_v29, %v341_v1 }
 0x2d0   : > { %v620_v31 = vsel %vm516_vm4, %v619_v30, 0.0 }
 0x2d1   : > { %v621_v32 = vrot.slane %v620_v31, 4 }
 0x2d3   : > { %v622_v33 = vadd.f32 %v621_v32, %v620_v31 }
 0x2d5   : > { %v623_v34 = vrot.slane %v622_v33, 2 }
 0x2d7   : > { %v624_v35 = vadd.f32 %v623_v34, %v622_v33 }
 0x2d9   : > { %v625_v36 = vrot.slane %v624_v35, 1 }
 0x2db   : > { %v626_v25 = vadd.f32 %v625_v36, %v624_v35 }
 0x2dd   : > { %v628_v38 = vadd.f32 %v627_v37, %v626_v25 }
 0x2df   : > { %629 = vst.msk [vmem:[%s1117_s12 + $0x1] sm:$0x1] %vm526_vm5, %v628_v38 }
 0x2e0   : > { %887 = shalt.err (!%p884_p11)
}
 0x2e1   : > { %768 = dma.vmem_to_hbm [thread:$0]  (%p1081_p7), %s644_s13, 32, %s646_s10, %s631_s16  }
 0x2e2 PF: > { %p774_p13 = scmp.ge.s32.totalorder %s970_s30, 2  ;;  %s657_s12 = sand.u32 1, %s934_s21  }
 0x2e3   : > { %s658_s11 = scalar_lea.sflag [#allocation4], %s657_s12 }
 0x2e4   : > { %p771_p0 = pnand %p774_p13, %p1089_p12 }
 0x2e6   : > { %p772_p1 = pneg %p771_p0 }
 0x2e8   : > { %929 = dma.done.wait (%p772_p1), %s658_s11, 32  }
 0x2e9   : > { %931 = vsyncadd (%p772_p1), %s658_s11, 4294967264  ;;  %s19_s30 = sadd.s32 1, %s970_s30   ;;  %s1301_s15 = sld [smem:[#allocation6_spill]] }
 0x2ea   : > { %p16_p2 = scmp.ge.s32.totalorder %s19_s30, 10   ;;  %s1302_s13 = sld [smem:[#allocation7_spill]] }
 0x2eb   : > { %s1303_s21 = smov %s938_s22  ;;  %s1304_s22 = smov %s942_s23 }
 0x2ec   : > { %s1305_s23 = smov %s1094_s19  ;;  %s1306_s24 = smov %s950_s25 }
 0x2ed   : > { %s1307_s25 = smov %s1097_s20  ;;  %s1308_s26 = smov %s962_s28 }
 0x2ee   : > { %s1309_s27 = smov %s966_s29  ;;  %18 = sbr.rel (!%p16_p2) target bundleno = 6 (0x6), region = 130 }
 0x2ef   : > { %s1310_s28 = smov %s1301_s15 }
 0x2f0   : > { %s1311_s29 = smov %s1302_s13 }
 0x2f3   :  { %664 = vsyncpa [#allocation4], 1 }
 0x2f4   :  { %666 = vsyncpa [#allocation4 + $0x1], 1 }

</bundles_post_ra>
